<compile_context>
chip_gen: v7x
topology: tpu7x:2x2x1
jax: 0.10.0
libtpu: 0.0.40
codegen_flags: <defaults>
</compile_context>

<pallas_src>
import functools

import jax
import jax.numpy as jnp
from jax import lax
from jax.experimental import pallas as pl
from jax.experimental.pallas import tpu as pltpu

EPS = 1e-5      # nn.BatchNorm2d default
LANE = 128      # NOTE: on v6e/v7x with real Cout >= 128, pad to 256 to fill
                # the 2x256 MXU; keep 128 on v5e (4x128^2 MXU).


def _round_up(a, b):
    return (a + b - 1) // b * b


# ----------------------------------------------------------------------------
# Pass 1: tiled GEMM + per-core Welford batch statistics -> partial (mean, M2)
#   grid = (2, n_half): axis 0 "parallel" (megacore split of M on v7x),
#   axis 1 "arbitrary" (streaming accumulation within this core's half).
# ----------------------------------------------------------------------------
def _conv_stats_kernel(patches_ref, w_ref, stats_ref, mean_acc, m2_acc,
                       *, tm, n_half, m_total):
    c = pl.program_id(0)          # which half of M (one per TensorCore on v7x)
    j = pl.program_id(1)          # tile index within this half

    @pl.when(j == 0)
    def _init():
        mean_acc[...] = jnp.zeros_like(mean_acc)
        m2_acc[...] = jnp.zeros_like(m2_acc)

    # bf16 x bf16 -> f32 accumulate on the MXU.
    conv = jnp.dot(patches_ref[...], w_ref[...],
                   preferred_element_type=jnp.float32)        # (tm, Cout_pad)

    # Valid-row bookkeeping: rows >= m_total are zero padding.
    t = c * n_half + j
    n_b_i = jnp.clip(m_total - t * tm, 0, tm)                 # rows in this tile
    n_a_i = jnp.clip(m_total - c * (n_half * tm), 0, j * tm)  # rows seen so far
    n_b = n_b_i.astype(jnp.float32)
    n_a = n_a_i.astype(jnp.float32)

    # Per-tile *centered* stats + streaming Chan/Welford combine: avoids the
    # E[x^2]-E[x]^2 catastrophic cancellation when |mean| >> std.
    sum_b = jnp.sum(conv, axis=0, keepdims=True)              # zero rows add 0
    mu_b = sum_b / jnp.maximum(n_b, 1.0)
    row = lax.broadcasted_iota(jnp.int32, (tm, 1), 0)
    centered = jnp.where(row < n_b_i, conv - mu_b, 0.0)
    m2_b = jnp.sum(centered * centered, axis=0, keepdims=True)

    denom = jnp.maximum(n_a + n_b, 1.0)
    delta = mu_b - mean_acc[...]
    mean_acc[...] = mean_acc[...] + delta * (n_b / denom)
    m2_acc[...] = m2_acc[...] + m2_b + (delta * delta) * (n_a * n_b / denom)

    @pl.when(j == pl.num_programs(1) - 1)
    def _finalize():
        # Per-core partial stats; the (cheap) cross-core combine + BN fold
        # happens in the wrapper so both cores stay fully parallel.
        stats_ref[...] = jnp.concatenate([mean_acc[...], m2_acc[...]], axis=0)


# ----------------------------------------------------------------------------
# Pass 2: recompute conv tile, folded-BN FMA + Mish epilogue (lane-dense out)
# ----------------------------------------------------------------------------
def _norm_mish_kernel(patches_ref, w_ref, scale_bias_ref, out_ref):
    conv = jnp.dot(patches_ref[...], w_ref[...],
                   preferred_element_type=jnp.float32)        # (tm, Cout_pad)
    y = conv * scale_bias_ref[0:1, :] + scale_bias_ref[1:2, :]

    # Mish(y) = y * tanh(softplus(y)).  With t = exp(min(y, 20)):
    #   tanh(softplus(y)) = t*(t+2) / (t*(t+2) + 2)
    # (exact identity; min() matches PyTorch softplus threshold=20 to f32
    # precision).  1 exp + 1 approx-reciprocal instead of exp+log1p+tanh.
    # Epilogue stays f32 (v5e has no bf16 VPU/EUP).
    t = jnp.exp(jnp.minimum(y, 20.0))
    u = t * (t + 2.0)
    mish = y * u * pl.reciprocal(u + 2.0, approx=True)
    out_ref[...] = mish.astype(out_ref.dtype)


# ----------------------------------------------------------------------------
# Wrapper
# ----------------------------------------------------------------------------
def bn_conv_mish(x_nchw, weight, gamma, beta, stride, padding, *,
                 tm=512, out_dtype=jnp.bfloat16, out_layout="NCHW"):
    """x_nchw: [N, Cin, H, W]; weight: [Cout, Cin, kh, kw]; gamma/beta: [Cout]."""
    N, Cin, H, W = x_nchw.shape
    Cout, _, kh, kw = weight.shape
    Ho = (H + 2 * padding - kh) // stride + 1
    Wo = (W + 2 * padding - kw) // stride + 1
    M = N * Ho * Wo
    K = Cin * kh * kw

    # --- glue: im2col in bf16 (no separate cast pass) -------------------------
    # TODO(synk): fuse this into the kernels (see header) - it is the remaining
    # kh*kw HBM read amplification + one M*K HBM write.
    xb = x_nchw.astype(jnp.bfloat16)
    xp = jnp.pad(xb, ((0, 0), (0, 0), (padding, padding), (padding, padding)))
    cols = []
    for i in range(kh):
        for j in range(kw):
            cols.append(xp[:, :, i:i + stride * Ho:stride, j:j + stride * Wo:stride])
    patches = (jnp.stack(cols, axis=2)            # [N, Cin, kh*kw, Ho, Wo]
               .transpose(0, 3, 4, 1, 2)          # [N, Ho, Wo, Cin, kh*kw]
               .reshape(M, K))                    # K order matches weight.reshape

    # --- tiling / padding -----------------------------------------------------
    # tm multiple of 16 (bf16 sublane packing); cap so the 2-way megacore split
    # of pass 1 always has real work on both halves.
    tm = max(16, min(tm, _round_up(-(-M // 2), 16)))
    n_mt = -(-M // tm)
    n_half = -(-n_mt // 2)
    M_pad = 2 * n_half * tm
    Cout_pad = _round_up(Cout, LANE)              # lane-dense output stores

    patches = jnp.pad(patches, ((0, M_pad - M), (0, 0)))
    w2d = jnp.pad(weight.reshape(Cout, K).T,
                  ((0, 0), (0, Cout_pad - Cout))).astype(jnp.bfloat16)   # [K, Cout_pad]

    # VMEM budget (per buffer, x2 for double buffering):
    #   tm*K*2 (patches) + K*Cout_pad*2 (w) + tm*Cout_pad*{2,4} (out/acc)
    # comfortably under the 32 MiB scoped limit on all of v5e/v6e/v7x.
    cp1 = pltpu.CompilerParams(dimension_semantics=("parallel", "arbitrary"),
                               vmem_limit_bytes=32 * 1024 * 1024)
    cp2 = pltpu.CompilerParams(dimension_semantics=("parallel",),
                               vmem_limit_bytes=32 * 1024 * 1024)

    # ---- pass 1: per-core GEMM + Welford stats --------------------------------
    stats = pl.pallas_call(
        functools.partial(_conv_stats_kernel, tm=tm, n_half=n_half, m_total=M),
        out_shape=jax.ShapeDtypeStruct((2, 2, Cout_pad), jnp.float32),
        grid_spec=pltpu.PrefetchScalarGridSpec(
            num_scalar_prefetch=0,
            grid=(2, n_half),
            in_specs=[
                pl.BlockSpec((tm, K), lambda c, j: (c * n_half + j, 0)),
                pl.BlockSpec((K, Cout_pad), lambda c, j: (0, 0)),
            ],
            out_specs=pl.BlockSpec((None, 2, Cout_pad), lambda c, j: (c, 0, 0)),
            scratch_shapes=[pltpu.VMEM((1, Cout_pad), jnp.float32),
                            pltpu.VMEM((1, Cout_pad), jnp.float32)],
        ),
        compiler_params=cp1,
    )(patches, w2d)

    # ---- tiny JAX epilogue: combine the two halves + fold BN ------------------
    count0 = min(M, n_half * tm)
    count1 = M - count0
    mean0, m2_0 = stats[0, 0], stats[0, 1]
    mean1, m2_1 = stats[1, 0], stats[1, 1]
    delta = mean1 - mean0
    mean = mean0 + delta * (count1 / M)
    m2 = m2_0 + m2_1 + delta * delta * (count0 * count1 / M)
    var = jnp.maximum(m2 / M, 0.0)                # biased variance (BN train mode)
    gamma_p = jnp.pad(gamma.astype(jnp.float32), (0, Cout_pad - Cout))
    beta_p = jnp.pad(beta.astype(jnp.float32), (0, Cout_pad - Cout))
    scale = gamma_p * lax.rsqrt(var + EPS)
    bias = beta_p - mean * scale
    scale_bias = jnp.stack([scale, bias], axis=0)          # (2, Cout_pad) f32

    # ---- pass 2: normalize + Mish (independent tiles, megacore-parallel) -----
    out2d = pl.pallas_call(
        _norm_mish_kernel,
        out_shape=jax.ShapeDtypeStruct((M_pad, Cout_pad), out_dtype),
        grid_spec=pltpu.PrefetchScalarGridSpec(
            num_scalar_prefetch=0,
            grid=(2 * n_half,),
            in_specs=[
                pl.BlockSpec((tm, K), lambda i: (i, 0)),
                pl.BlockSpec((K, Cout_pad), lambda i: (0, 0)),
                pl.BlockSpec((2, Cout_pad), lambda i: (0, 0)),
            ],
            out_specs=pl.BlockSpec((tm, Cout_pad), lambda i: (i, 0)),
        ),
        compiler_params=cp2,
    )(patches, w2d, scale_bias)

    out_nhwc = out2d[:M, :Cout].reshape(N, Ho, Wo, Cout)
    if out_layout == "NHWC":
        return out_nhwc
    # NOTE: this transpose is one full extra HBM read+write of the output;
    # prefer out_layout="NHWC" when the consumer accepts channels-last.
    return out_nhwc.transpose(0, 3, 1, 2)


# ----------------------------------------------------------------------------
# Pure-JAX reference (f32) and test
# ----------------------------------------------------------------------------
def _reference(x_nchw, weight, gamma, beta, stride, padding):
    conv = lax.conv_general_dilated(
        x_nchw, weight, window_strides=(stride, stride),
        padding=[(padding, padding), (padding, padding)],
        dimension_numbers=("NCHW", "OIHW", "NCHW"))
    mean = jnp.mean(conv, axis=(0, 2, 3), keepdims=True)
    var = jnp.mean((conv - mean) ** 2, axis=(0, 2, 3), keepdims=True)
    y = (conv - mean) * lax.rsqrt(var + EPS)
    y = y * gamma.reshape(1, -1, 1, 1) + beta.reshape(1, -1, 1, 1)
    sp = jnp.where(y > 20.0, y, jnp.log1p(jnp.exp(jnp.minimum(y, 20.0))))
    return y * jnp.tanh(sp)


if __name__ == "__main__":
    # BN_Conv_Mish(in_channels=4, out_channels=8, kernel_size=3, stride=1, padding=1)
    N, Cin, H, W = 2, 4, 16, 16
    Cout, ksize, stride, padding = 8, 3, 1, 1

    key = jax.random.PRNGKey(0)
    kx, kw, kg, kb = jax.random.split(key, 4)
    x = jax.random.normal(kx, (N, Cin, H, W), dtype=jnp.float32)
    weight = jax.random.normal(kw, (Cout, Cin, ksize, ksize), dtype=jnp.float32) * 0.1
    gamma = 1.0 + 0.1 * jax.random.normal(kg, (Cout,), dtype=jnp.float32)
    beta = 0.1 * jax.random.normal(kb, (Cout,), dtype=jnp.float32)

    out = bn_conv_mish(x, weight, gamma, beta, stride, padding)
    out = jax.block_until_ready(out)

    ref = _reference(x, weight, gamma, beta, stride, padding)
    assert out.shape == (N, Cout, H, W)
    # Accuracy contract: bf16 MXU inputs (f32 accumulate), approx reciprocal in
    # the Mish epilogue, and bf16 output -> bf16-level tolerance vs strict f32.
    assert jnp.allclose(out.astype(jnp.float32), ref, atol=2e-2, rtol=2e-2)

    print("KERNEL_OK")
</pallas_src>

<mosaic_0001>
module attributes {stable_mosaic.version = 11 : i64} {
  func.func @_conv_stats_kernel(%arg0: i32, %arg1: i32, %arg2: memref<256x36xbf16, #tpu.memory_space<vmem>>, %arg3: memref<36x128xbf16, #tpu.memory_space<vmem>>, %arg4: memref<1x2x128xf32, #tpu.memory_space<vmem>>, %arg5: memref<1x128xf32, #tpu.memory_space<vmem>>, %arg6: memref<1x128xf32, #tpu.memory_space<vmem>>) attributes {dimension_semantics = [#tpu.dimension_semantics<parallel>, #tpu.dimension_semantics<arbitrary>], iteration_bounds = array<i64: 2, 1>, scalar_prefetch = 0 : i64, scratch_operands = 2 : i64, tpu.core_type = #tpu.core_type<tc>, window_params = [{transform_indices = @transform_0, window_bounds = array<i64: 256, 36>}, {pipeline_mode = #tpu.pipeline_mode<synchronous>, transform_indices = @transform_1, window_bounds = array<i64: 36, 128>}, {transform_indices = @transform_2, window_bounds = array<i64: 1, 2, 128>}]} {
    %c0_i32 = arith.constant 0 : i32
    %0 = arith.cmpi eq, %arg1, %c0_i32 : i32
    %1 = arith.extui %0 : i1 to i32
    %c0_i32_0 = arith.constant 0 : i32
    %2 = arith.cmpi ne, %1, %c0_i32_0 : i32
    scf.if %2 {
      %cst_27 = arith.constant 0.000000e+00 : f32
      %58 = vector.broadcast %cst_27 : f32 to vector<1x128xf32>
      %c0_28 = arith.constant 0 : index
      %c0_29 = arith.constant 0 : index
      %59 = vector.load %arg5[%c0_28, %c0_29] : memref<1x128xf32, #tpu.memory_space<vmem>>, vector<1x128xf32>
      tpu.vector_store %arg5[%c0_28, %c0_29], %58 {strides = array<i32>} : memref<1x128xf32, #tpu.memory_space<vmem>>, vector<1x128xf32>,
      %cst_30 = arith.constant 0.000000e+00 : f32
      %60 = vector.broadcast %cst_30 : f32 to vector<1x128xf32>
      %c0_31 = arith.constant 0 : index
      %c0_32 = arith.constant 0 : index
      %61 = vector.load %arg6[%c0_31, %c0_32] : memref<1x128xf32, #tpu.memory_space<vmem>>, vector<1x128xf32>
      tpu.vector_store %arg6[%c0_31, %c0_32], %60 {strides = array<i32>} : memref<1x128xf32, #tpu.memory_space<vmem>>, vector<1x128xf32>,
    } else {
    }
    %c0 = arith.constant 0 : index
    %c0_1 = arith.constant 0 : index
    %3 = vector.load %arg2[%c0, %c0_1] : memref<256x36xbf16, #tpu.memory_space<vmem>>, vector<256x36xbf16>
    %c0_2 = arith.constant 0 : index
    %c0_3 = arith.constant 0 : index
    %4 = vector.load %arg3[%c0_2, %c0_3] : memref<36x128xbf16, #tpu.memory_space<vmem>>, vector<36x128xbf16>
    %cst = arith.constant dense<0.000000e+00> : vector<256x128xf32>
    %5 = tpu.matmul %3, %4, %cst {dimension_numbers = #tpu.dot_dimension_numbers<[1], [0], [0], [1], [0, 0, 1, 1], [], []>} : vector<256x36xbf16>, vector<36x128xbf16>, vector<256x128xf32> -> vector<256x128xf32>
    %c1_i32 = arith.constant 1 : i32
    %6 = arith.muli %arg0, %c1_i32 : i32
    %7 = arith.addi %6, %arg1 : i32
    %c256_i32 = arith.constant 256 : i32
    %8 = arith.muli %7, %c256_i32 : i32
    %c512_i32 = arith.constant 512 : i32
    %9 = arith.subi %c512_i32, %8 : i32
    %c0_i32_4 = arith.constant 0 : i32
    %c256_i32_5 = arith.constant 256 : i32
    %10 = arith.maxsi %c0_i32_4, %9 : i32
    %11 = arith.minsi %c256_i32_5, %10 : i32
    %c256_i32_6 = arith.constant 256 : i32
    %12 = arith.muli %arg0, %c256_i32_6 : i32
    %c512_i32_7 = arith.constant 512 : i32
    %13 = arith.subi %c512_i32_7, %12 : i32
    %c256_i32_8 = arith.constant 256 : i32
    %14 = arith.muli %arg1, %c256_i32_8 : i32
    %c0_i32_9 = arith.constant 0 : i32
    %15 = arith.maxsi %c0_i32_9, %13 : i32
    %16 = arith.minsi %14, %15 : i32
    %17 = arith.sitofp %11 : i32 to f32
    %18 = arith.sitofp %16 : i32 to f32
    %cst_10 = arith.constant dense<0.000000e+00> : vector<128xf32>
    %19 = vector.multi_reduction <add>, %5, %cst_10 [0] : vector<256x128xf32> to vector<128xf32>
    %20 = vector.shape_cast %19 : vector<128xf32> to vector<1x128xf32>
    %cst_11 = arith.constant 1.000000e+00 : f32
    %21 = arith.maximumf %17, %cst_11 : f32
    %22 = vector.broadcast %21 : f32 to vector<1x128xf32>
    %23 = arith.divf %20, %22 : vector<1x128xf32>
    %24 = tpu.iota {dimensions = array<i32: 0>} : vector<256x1xi32>
    %25 = vector.broadcast %11 : i32 to vector<256x1xi32>
    %26 = arith.cmpi slt, %24, %25 : vector<256x1xi32>
    %27 = vector.broadcast %23 : vector<1x128xf32> to vector<256x128xf32>
    %28 = arith.subf %5, %27 : vector<256x128xf32>
    %cst_12 = arith.constant 0.000000e+00 : f32
    %29 = vector.shape_cast %26 : vector<256x1xi1> to vector<256x1xi1>
    %30 = vector.broadcast %29 : vector<256x1xi1> to vector<256x128xi1>
    %31 = vector.broadcast %cst_12 : f32 to vector<256x128xf32>
    %32 = arith.select %30, %28, %31 : vector<256x128xi1>, vector<256x128xf32>
    %33 = arith.mulf %32, %32 : vector<256x128xf32>
    %cst_13 = arith.constant dense<0.000000e+00> : vector<128xf32>
    %34 = vector.multi_reduction <add>, %33, %cst_13 [0] : vector<256x128xf32> to vector<128xf32>
    %35 = vector.shape_cast %34 : vector<128xf32> to vector<1x128xf32>
    %36 = arith.addf %18, %17 : f32
    %cst_14 = arith.constant 1.000000e+00 : f32
    %37 = arith.maximumf %36, %cst_14 : f32
    %c0_15 = arith.constant 0 : index
    %c0_16 = arith.constant 0 : index
    %38 = vector.load %arg5[%c0_15, %c0_16] : memref<1x128xf32, #tpu.memory_space<vmem>>, vector<1x128xf32>
    %39 = arith.subf %23, %38 : vector<1x128xf32>
    %c0_17 = arith.constant 0 : index
    %c0_18 = arith.constant 0 : index
    %40 = vector.load %arg5[%c0_17, %c0_18] : memref<1x128xf32, #tpu.memory_space<vmem>>, vector<1x128xf32>
    %41 = arith.divf %17, %37 : f32
    %42 = vector.broadcast %41 : f32 to vector<1x128xf32>
    %43 = arith.mulf %39, %42 : vector<1x128xf32>
    %44 = arith.addf %40, %43 : vector<1x128xf32>
    %c0_19 = arith.constant 0 : index
    %c0_20 = arith.constant 0 : index
    %45 = vector.load %arg5[%c0_19, %c0_20] : memref<1x128xf32, #tpu.memory_space<vmem>>, vector<1x128xf32>
    tpu.vector_store %arg5[%c0_19, %c0_20], %44 {strides = array<i32>} : memref<1x128xf32, #tpu.memory_space<vmem>>, vector<1x128xf32>,
    %c0_21 = arith.constant 0 : index
    %c0_22 = arith.constant 0 : index
    %46 = vector.load %arg6[%c0_21, %c0_22] : memref<1x128xf32, #tpu.memory_space<vmem>>, vector<1x128xf32>
    %47 = arith.addf %46, %35 : vector<1x128xf32>
    %48 = arith.mulf %39, %39 : vector<1x128xf32>
    %49 = arith.mulf %18, %17 : f32
    %50 = arith.divf %49, %37 : f32
    %51 = vector.broadcast %50 : f32 to vector<1x128xf32>
    %52 = arith.mulf %48, %51 : vector<1x128xf32>
    %53 = arith.addf %47, %52 : vector<1x128xf32>
    %c0_23 = arith.constant 0 : index
    %c0_24 = arith.constant 0 : index
    %54 = vector.load %arg6[%c0_23, %c0_24] : memref<1x128xf32, #tpu.memory_space<vmem>>, vector<1x128xf32>
    tpu.vector_store %arg6[%c0_23, %c0_24], %53 {strides = array<i32>} : memref<1x128xf32, #tpu.memory_space<vmem>>, vector<1x128xf32>,
    %c0_i32_25 = arith.constant 0 : i32
    %55 = arith.cmpi eq, %arg1, %c0_i32_25 : i32
    %56 = arith.extui %55 : i1 to i32
    %c0_i32_26 = arith.constant 0 : i32
    %57 = arith.cmpi ne, %56, %c0_i32_26 : i32
    scf.if %57 {
      %c0_27 = arith.constant 0 : index
      %c0_28 = arith.constant 0 : index
      %58 = vector.load %arg5[%c0_27, %c0_28] : memref<1x128xf32, #tpu.memory_space<vmem>>, vector<1x128xf32>
      %c0_29 = arith.constant 0 : index
      %c0_30 = arith.constant 0 : index
      %59 = vector.load %arg6[%c0_29, %c0_30] : memref<1x128xf32, #tpu.memory_space<vmem>>, vector<1x128xf32>
      %60 = tpu.concatenate %58, %59 in 0 : vector<1x128xf32>, vector<1x128xf32> -> vector<2x128xf32>
      %c0_31 = arith.constant 0 : index
      %c0_32 = arith.constant 0 : index
      %c0_33 = arith.constant 0 : index
      %61 = vector.load %arg4[%c0_31, %c0_32, %c0_33] : memref<1x2x128xf32, #tpu.memory_space<vmem>>, vector<1x2x128xf32>
      %62 = vector.shape_cast %61 : vector<1x2x128xf32> to vector<2x128xf32>
      %63 = vector.shape_cast %60 : vector<2x128xf32> to vector<1x2x128xf32>
      tpu.vector_store %arg4[%c0_31, %c0_32, %c0_33], %63 {strides = array<i32>} : memref<1x2x128xf32, #tpu.memory_space<vmem>>, vector<1x2x128xf32>,
    } else {
    }
    return
  }
  func.func @transform_0(%arg0: i32, %arg1: i32) -> (i32, i32) {
    %c1_i32 = arith.constant 1 : i32
    %0 = arith.muli %arg0, %c1_i32 : i32
    %1 = arith.addi %0, %arg1 : i32
    %c0_i32 = arith.constant 0 : i32
    %c0_i32_0 = arith.constant 0 : i32
    return %1, %c0_i32 : i32, i32
  }
  func.func @transform_1(%arg0: i32, %arg1: i32) -> (i32, i32) {
    %c0_i32 = arith.constant 0 : i32
    %c0_i32_0 = arith.constant 0 : i32
    %c0_i32_1 = arith.constant 0 : i32
    return %c0_i32, %c0_i32_0 : i32, i32
  }
  func.func @transform_2(%arg0: i32, %arg1: i32) -> (i32, i32, i32) {
    %c0_i32 = arith.constant 0 : i32
    %c0_i32_0 = arith.constant 0 : i32
    %c0_i32_1 = arith.constant 0 : i32
    return %arg0, %c0_i32, %c0_i32_0 : i32, i32, i32
  }
}

</mosaic_0001>

<bundles_post_ra>
// kernel: tpu_custom_call.1
= control target key start
LH: loop header
LB: loop body
LE: loop exit
PB: predicated region body
PF: predicated region fallthrough
CT: control target
= control target key end

     0   :  { %7 = vsyncpa [#allocation5], 0  ;;  %s1910_s0 = inlined_call_operand.vmem [shape: bf16[512,36], index: 0, kind: input, shape index: {}]   ;;  %s1911_s1 = inlined_call_operand.vmem [shape: bf16[36,128], index: 1, kind: input, shape index: {}]   ;;  %s1912_s2 = inlined_call_operand.hbm [shape: f32[2,2,128], index: 2, kind: output, shape index: {}]  }
   0x1   :  { %9 = vsyncpa [#allocation5 + $0x1], 0  ;;  %s1261_s9 = smov 0   ;;  %s1263_s10 = smov 0  }
   0x2   :  { %s1265_s11 = smov 0   ;;  %s1267_s12 = smov 0  }
   0x3   :  { %s1269_s13 = smov 0   ;;  %s1271_s14 = smov 0  }
   0x4 LB: > { %s955_s15 = sadd.s32 4294967295, %s1241_s14   ;;  %s956_s16 = sadd.s32 4294967294, %s1241_s14   ;;  %s1241_s14 = sphi %s1271_s14, %s15_s14   ;;  %s1237_s13 = sphi %s1269_s13, %s1962_s13   ;;  %s1233_s12 = sphi %s1267_s12, %s1961_s12   ;;  %s1229_s11 = sphi %s1265_s11, %s1960_s11   ;;  %s1225_s10 = sphi %s1263_s10, %s1959_s10   ;;  %s1221_s9 = sphi %s1261_s9, %s1958_s9  }
   0x5   : > { %s27_s17 = sadd.s32 1, %s1237_s13  ;;  %s83_s18 = sadd.s32 1, %s1229_s11 }
   0x6   : > { %p29_p0 = scmp.ge.s32.totalorder %s27_s17, 2  ;;  %p93_p1 = scmp.ne.s32.totalorder %s1229_s11, %s1225_s10 }
   0x7   : > { %p94_p2 = scmp.eq.s32.totalorder %s955_s15, 1  ;;  %p99_p3 = scmp.ne.s32.totalorder %s1225_s10, %s1221_s9 }
   0x8   : > { %s1964_s17 = smov (%p29_p0, %s27_s17), 0  ;;  %p100_p5 = scmp.eq.s32.totalorder %s956_s16, 1 }
   0x9   : > { %p1301_p4 = por %p94_p2, %p93_p1  ;;  %s80_s20 = ssub.s32 %s1237_s13, %s1964_s17 }
   0xa   : > { %p959_p6 = scmp.ge.s32.totalorder %s1241_s14, 1  ;;  %p81_p7 = scmp.eq.s32.totalorder %s80_s20, 0 }
   0xb   : > { %p1308_p8 = por %p100_p5, %p99_p3  ;;  %p132_p9 = scmp.lt.s32.totalorder %s1241_s14, 3 }
   0xc   : > { %s1314_s22 = scalar_select %p81_p7, %s1229_s11, %s83_s18  }
   0xd   : > { %p133_p10 = pnand %p959_p6, %p132_p9 }
   0xf   : > { %136 = sbr.rel (%p133_p10) target bundleno = 450 (0x1c2), region = 28 }
  0x16   : > { %v1140_v0 = vld [vmem:[%s1911_s1] sm:$0xff]   ;;  %v1141_v1 = vld [vmem:[%s1911_s1 + $0x8] sm:$0xff]   ;;  %s1323_s27 = sshll.u32 %s1233_s12, 5  ;;  %v1142_v2 = vld [vmem:[%s1911_s1 + $0x10] ss:$0 sps:$4 sm:$0x33]  }
  0x17   : > { %1035 = vmatprep.subr.bf16.mxu0 %v1140_v0  ;;  %p157_p11 = scmp.lt.s32.totalorder %s1323_s27, 63  ;;  %1073 = vmatprep.subr.bf16.mxu1 %v1140_v0  ;;  %vm351_vm0 = vcmask 1041408   ;;  %vm302_vm1 = vcmask 293888   ;;  %s998_s7 = sshll.u32 %s1233_s12, 8  ;;  %v1244_v22 = vmov 0.0  }
  0x18   : > { %1036 = vmatpush3.bf16.msra.mxu0 %v1140_v0  ;;  %1076 = vmatpush3.bf16.msra.mxu1 %v1140_v0  ;;  %v353_v3 = vsel %vm351_vm0, %v1142_v2, 0  ;;  %s518_s8 = ssub.s32 512, %s998_s7  ;;  %s1243_s23 = smov 1.0   ;;  %168 = vst [vmem:[#allocation2] sm:$0x1] %v1244_v22 }
  0x19   : > { %1037 = vmatprep.subr.bf16.mxu0 %v1141_v1  ;;  %s158_s30 = scalar_select %p157_p11, %s1323_s27, 63  ;;  %1074 = vmatprep.subr.bf16.mxu1 %v1141_v1  ;;  %169 = vst [vmem:[#allocation3] sm:$0x1] %v1244_v22  ;;  %v573_v22 = vlaneseq }
  0x1a   : > { %p519_p12 = scmp.gt.s32.totalorder %s518_s8, 0  ;;  %p999_p13 = scmp.lt.s32.totalorder %s518_s8, 256 }
  0x1b   : > { %s962_s3 = sshll.u32 %s158_s30, 2  ;;  %s152_s30 = sand.u32 1, %s1225_s10  }
  0x1c   : > { %1038 = vmatpush3.bf16.msra.mxu0 %v1141_v1  ;;  %s1333_s6 = scalar_lea.vmem %s1910_s0, %s962_s3  ;;  %1077 = vmatpush3.bf16.msra.mxu1 %v1141_v1  ;;  %s1966_s8 = smov (!%p519_p12, %s518_s8), 0 }
  0x1d   : > { %1079 = vmatprep.subr.msk.bf16.mxu0 %vm351_vm0, %v1142_v2  ;;  %v1143_v4 = vld [vmem:[%s1333_s6] sm:$0xff]   ;;  %1080 = vmatprep.subr.msk.bf16.mxu1 %vm351_vm0, %v1142_v2  ;;  %v1144_v5 = vld [vmem:[%s1333_s6 + $0x8] sm:$0xff]   ;;  %v1145_v6 = vld [vmem:[%s1333_s6 + $0x10] sm:$0xff]   ;;  %s1368_s15 = scalar_select %p999_p13, %s1966_s8, 256 }
  0x1e   : > { %1041 = vmatprep.mubr.msk.bf16.mxu0 %vm302_vm1, %v1143_v4  ;;  %v1146_v7 = vld [vmem:[%s1333_s6 + $0x18] sm:$0xff]   ;;  %v1151_v8 = vld [vmem:[%s1333_s6 + $0x40] sm:$0xff]   ;;  %v1152_v9 = vld [vmem:[%s1333_s6 + $0x48] sm:$0xff]   ;;  %s1968_s8 = smov (%p519_p12, %s1966_s8), 0  ;;  %s960_s3 = sshll.u32 %s152_s30, 1 }
  0x1f   : > { %1057 = vmatprep.mubr.msk.bf16.mxu1 %vm302_vm1, %v1151_v8  ;;  %v1153_v10 = vld [vmem:[%s1333_s6 + $0x50] sm:$0xff]   ;;  %v1147_v11 = vld [vmem:[%s1333_s6 + $0x20] sm:$0xff]   ;;  %v1154_v12 = vld [vmem:[%s1333_s6 + $0x58] sm:$0xff]   ;;  %s1373_s16 = scvt.s32.f32 %s1368_s15  ;;  %s531_s18 = scvt.s32.f32 %s1968_s8 }
  0x20   : > { %1040 = vmatpush3.bf16.msra.mxu0 %v353_v3  ;;  %1078 = vmatpush3.bf16.msra.mxu1 %v353_v3  ;;  %v1155_v13 = vld [vmem:[%s1333_s6 + $0x60] sm:$0xff]   ;;  %v1148_v14 = vld [vmem:[%s1333_s6 + $0x28] sm:$0xff]   ;;  %v1149_v15 = vld [vmem:[%s1333_s6 + $0x30] sm:$0xff]   ;;  %s154_s4 = scalar_lea.vmem [#allocation4], %s960_s3  ;;  %s1863_s8 = scalar_lea.hbm %s1912_s2, %s1323_s27 }
  0x21   : > { %v1156_v16 = vld [vmem:[%s1333_s6 + $0x68] sm:$0xff]   ;;  %v1157_v17 = vld [vmem:[%s1333_s6 + $0x70] sm:$0xff]   ;;  %v1150_v18 = vld [vmem:[%s1333_s6 + $0x38] sm:$0xff]   ;;  %s836_s20 = sadd.f32 %s531_s18, %s1373_s16  ;;  %s569_s24 = smax.f32 %s1243_s23, %s1373_s16 }
  0x22   : > { %v1158_v19 = vld [vmem:[%s1333_s6 + $0x78] sm:$0xff]   ;;  %s851_s26 = smul.f32 %s531_s18, %s1373_s16  ;;  %s888_s5 = sshll.u32 %s154_s4, 4  ;;  %s1865_s5 = int_to_ptr.vmem [resolvable:$true] %s888_s5 }
  0x23   : > { %1042 = vmatmul.mubr.msk.bf16.vlgmr.msra.gmra.mrb[0].mxu0 %vm302_vm1, %v1144_v5  ;;  %1058 = vmatmul.mubr.msk.bf16.vlgmr.msra.gmra.mrb[0].mxu1 %vm302_vm1, %v1152_v9  ;;  %s837_s12 = smax.f32 %s1243_s23, %s836_s20  ;;  %s1245_s18 = smov [#allocation4]  }
  0x24   : > { %1045 = vmatprep.mubr.msk.bf16.mxu0 %vm302_vm1, %v1145_v6  ;;  %1061 = vmatprep.mubr.msk.bf16.mxu1 %vm302_vm1, %v1153_v10  ;;  %v840_v20 = vstv %s837_s12  ;;  %s1167_s20 = sshll.u32 %s1245_s18, 4  ;;  %s1168_s20 = int_to_ptr.vmem [resolvable:$false] %s1167_s20 }
  0x25   : > { %1159 = vrcp.f32 %v840_v20  ;;  %v570_v20 = vstv %s569_s24  ;;  %s1169_s23 = scalar_lea.vmem %s1168_s20, 64  ;;  %p1170_p3 = scmp.lt.s32.totalorder %s1865_s5, %s1168_s20 }
  0x26   : > { %1161 = vrcp.f32 %v570_v20 }
  0x2b   : > { %1046 = vmatmul.mubr.msk.bf16.gmra.mrb[4].mxu0 %vm302_vm1, %v1146_v7  ;;  %1062 = vmatmul.mubr.msk.bf16.gmra.mrb[4].mxu1 %vm302_vm1, %v1154_v12 }
  0x2c   : > { %1049 = vmatprep.mubr.msk.bf16.mxu0 %vm302_vm1, %v1147_v11  ;;  %1065 = vmatprep.mubr.msk.bf16.mxu1 %vm302_vm1, %v1155_v13 }
  0x2f   : > { %v1160_v21 = vpop.eup %1159 }
  0x30   : > { %1081 = vpush %v1160_v21 }
  0x33   : > { %1050 = vmatmul.mubr.msk.bf16.gmra.mrb[8].mxu0 %vm302_vm1, %v1148_v14  ;;  %1066 = vmatmul.mubr.msk.bf16.gmra.mrb[8].mxu1 %vm302_vm1, %v1156_v16 }
  0x34   : > { %1053 = vmatprep.mubr.msk.bf16.mxu0 %vm302_vm1, %v1149_v15  ;;  %1069 = vmatprep.mubr.msk.bf16.mxu1 %vm302_vm1, %v1157_v17 }
  0x3b   : > { %1054 = vmatmul.mubr.msk.bf16.gmra.mrb[12].mxu0 %vm302_vm1, %v1150_v18  ;;  %1070 = vmatmul.mubr.msk.bf16.gmra.mrb[12].mxu1 %vm302_vm1, %v1158_v19 }
  0x61   : > { %s1082_s25 = spop %1081 }
  0x62   : > { %s843_s28 = smul.f32 %s1082_s25, %s1373_s16  ;;  %s1163_s16 = scalar_lea.vmem %s1865_s5, 32 }
  0x63   : > { %s855_s29 = smul.f32 %s1082_s25, %s851_s26  ;;  %p1164_p0 = scmp.ne.s32.totalorder %s1865_s5, %s1163_s16 }
  0x64   : > { %p1171_p5 = scmp.lt.s32.totalorder %s1169_s23, %s1163_s16 }
  0x65   : > { %p1165_p1 = pnand %p1164_p0, %p1301_p4 }
  0x66   : > { %p1172_p6 = por %p1171_p5, %p1170_p3 }
  0x67   : > { %p1166_p2 = pneg %p1165_p1 }
  0x69   : > { %p1173_p7 = pnand %p1172_p6, %p1166_p2 }
  0xf6   : > { %v1380_v23 = vpop.f32.mrb[0].mxu0  ;;  %v1390_v28 = vpop.f32.mrb[0].mxu1 }
  0xf7   : > { %v1382_v24 = vpop.f32.mrb[1].mxu0  ;;  %v1393_v30 = vpop.f32.mrb[1].mxu1 }
  0xf8   : > { %v1384_v25 = vpop.f32.mrb[2].mxu0  ;;  %v1395_v31 = vpop.f32.mrb[2].mxu1 }
  0xf9   : > { %v1386_v26 = vpop.f32.mrb[3].mxu0  ;;  %v1400_v34 = vpop.f32.mrb[3].mxu1 }
  0xfa   : > { %v532_v27 = vadd.f32 %v1386_v26, %v1382_v24 }
  0xfc   : > { %v533_v29 = vadd.f32 %v1380_v23, %v532_v27 }
  0xfe   : > { %v1397_v32 = vpop.f32.mrb[4].mxu0  ;;  %v534_v33 = vadd.f32 %v1384_v25, %v533_v29  ;;  %v1410_v40 = vpop.f32.mrb[4].mxu1 }
  0xff   : > { %v1402_v35 = vpop.f32.mrb[5].mxu0  ;;  %v1413_v42 = vpop.f32.mrb[5].mxu1 }
 0x100   : > { %v535_v36 = vadd.f32 %v534_v33, %v1402_v35  ;;  %v1405_v37 = vpop.f32.mrb[6].mxu0  ;;  %v1415_v43 = vpop.f32.mrb[6].mxu1  ;;  %v1478_v33 = vshrl.u32 %v573_v22, 7 }
 0x101   : > { %v1407_v38 = vpop.f32.mrb[7].mxu0  ;;  %v1420_v46 = vpop.f32.mrb[7].mxu1 }
 0x102   : > { %v536_v39 = vadd.f32 %v535_v36, %v1407_v38  ;;  %v1555_v22 = vadd.s32 184, %v1478_v33 }
 0x104   : > { %v537_v41 = vadd.f32 %v1397_v32, %v536_v39 }
 0x106   : > { %v1417_v44 = vpop.f32.mrb[8].mxu0  ;;  %v538_v45 = vadd.f32 %v1405_v37, %v537_v41  ;;  %v1430_v52 = vpop.f32.mrb[8].mxu1  ;;  %v1481_v41 = vadd.s32 16, %v1478_v33 }
 0x107   : > { %v1422_v47 = vpop.f32.mrb[9].mxu0  ;;  %v1433_v54 = vpop.f32.mrb[9].mxu1 }
 0x108   : > { %v539_v48 = vadd.f32 %v538_v45, %v1422_v47  ;;  %v1425_v49 = vpop.f32.mrb[10].mxu0  ;;  %v1435_v55 = vpop.f32.mrb[10].mxu1  ;;  %v1484_v45 = vstv %s1368_s15  ;;  %s875_s15 = scalar_lea.sflag [#allocation5], %s152_s30 }
 0x109   : > { %v1427_v50 = vpop.f32.mrb[11].mxu0  ;;  %v1440_v58 = vpop.f32.mrb[11].mxu1  ;;  %vm609_vm2 = vcmp.lt.s32.totalorder %v1481_v41, %v1484_v45  ;;  %vm607_vm3 = vcmp.lt.s32.totalorder %v1478_v33, %v1484_v45 }
 0x10a   : > { %v540_v51 = vadd.f32 %v539_v48, %v1427_v50  ;;  %v1487_v48 = vadd.s32 24, %v1478_v33 }
 0x10c   : > { %v541_v53 = vadd.f32 %v1417_v44, %v540_v51  ;;  %v1490_v51 = vadd.s32 8, %v1478_v33  ;;  %vm610_vm4 = vcmp.lt.s32.totalorder %v1487_v48, %v1484_v45 }
 0x10e   : > { %v1437_v56 = vpop.f32.mrb[12].mxu0  ;;  %v542_v57 = vadd.f32 %v1425_v49, %v541_v53  ;;  %v1450_v0 = vpop.f32.mrb[12].mxu1  ;;  %v1493_v53 = vadd.s32 48, %v1478_v33  ;;  %vm608_vm5 = vcmp.lt.s32.totalorder %v1490_v51, %v1484_v45 }
 0x10f   : > { %v1442_v59 = vpop.f32.mrb[13].mxu0  ;;  %v1453_v2 = vpop.f32.mrb[13].mxu1 }
 0x110   : > { %v543_v60 = vadd.f32 %v542_v57, %v1442_v59  ;;  %v1445_v61 = vpop.f32.mrb[14].mxu0  ;;  %v1455_v3 = vpop.f32.mrb[14].mxu1  ;;  %1924 = vst [vmem:[#allocation7_spill] sm:$0xff] %v1493_v53  ;;  %v1496_v57 = vadd.s32 32, %v1478_v33  ;;  %vm613_vm6 = vcmp.lt.s32.totalorder %v1493_v53, %v1484_v45  ;;  %v1594_v53 = vadd.s32 224, %v1478_v33 }
 0x111   : > { %v1447_v62 = vpop.f32.mrb[15].mxu0  ;;  %v1458_v5 = vpop.f32.mrb[15].mxu1 }
 0x112   : > { %v544_v63 = vadd.f32 %v543_v60, %v1447_v62  ;;  %v1499_v60 = vadd.s32 56, %v1478_v33  ;;  %vm611_vm7 = vcmp.lt.s32.totalorder %v1496_v57, %v1484_v45  ;;  %vm635_vm0 = vcmp.lt.s32.totalorder %v1594_v53, %v1484_v45 }
 0x114   : > { %v545_v1 = vadd.f32 %v1437_v56, %v544_v63  ;;  %1925 = vst [vmem:[#allocation8_spill] sm:$0xff] %v1499_v60  ;;  %vm614_vm8 = vcmp.lt.s32.totalorder %v1499_v60, %v1484_v45  ;;  %v1591_v60 = vadd.s32 240, %v1478_v33 }
 0x116   : > { %v546_v4 = vadd.f32 %v1445_v61, %v545_v1  ;;  %v1502_v1 = vadd.s32 40, %v1478_v33  ;;  %1930 = vst [vmem:[#allocation13_spill] sm:$0xff] %v1591_v60  ;;  %vm637_vm14 = vcmp.lt.s32.totalorder %v1591_v60, %v1484_v45 }
 0x118   : > { %v547_v6 = vadd.f32 %v546_v4, %v1393_v30  ;;  %v1505_v4 = vadd.s32 80, %v1478_v33  ;;  %vm612_vm9 = vcmp.lt.s32.totalorder %v1502_v1, %v1484_v45 }
 0x11a   : > { %v548_v7 = vadd.f32 %v547_v6, %v1400_v34  ;;  %1926 = vst [vmem:[#allocation9_spill] sm:$0xff] %v1505_v4  ;;  %v1508_v6 = vadd.s32 64, %v1478_v33  ;;  %vm617_vm10 = vcmp.lt.s32.totalorder %v1505_v4, %v1484_v45 }
 0x11c   : > { %v549_v8 = vadd.f32 %v1390_v28, %v548_v7  ;;  %v1511_v7 = vadd.s32 88, %v1478_v33  ;;  %vm615_vm11 = vcmp.lt.s32.totalorder %v1508_v6, %v1484_v45 }
 0x11e   : > { %v550_v9 = vadd.f32 %v1395_v31, %v549_v8  ;;  %1927 = vst [vmem:[#allocation10_spill] sm:$0xff] %v1511_v7  ;;  %v1514_v8 = vadd.s32 72, %v1478_v33  ;;  %vm618_vm12 = vcmp.lt.s32.totalorder %v1511_v7, %v1484_v45 }
 0x120   : > { %v551_v10 = vadd.f32 %v550_v9, %v1413_v42  ;;  %1928 = vst [vmem:[#allocation11_spill] sm:$0xff] %v1514_v8  ;;  %v1517_v9 = vadd.s32 112, %v1478_v33  ;;  %vm616_vm13 = vcmp.lt.s32.totalorder %v1514_v8, %v1484_v45 }
 0x122   : > { %v552_v11 = vadd.f32 %v551_v10, %v1420_v46  ;;  %1929 = vst [vmem:[#allocation12_spill] sm:$0xff] %v1517_v9  ;;  %v1520_v10 = vadd.s32 96, %v1478_v33 }
 0x124   : > { %v553_v12 = vadd.f32 %v1410_v40, %v552_v11 }
 0x126   : > { %v554_v13 = vadd.f32 %v1415_v43, %v553_v12  ;;  %v1162_v12 = vpop.eup %1161 }
 0x128   : > { %v555_v14 = vadd.f32 %v554_v13, %v1433_v54  ;;  %v1523_v13 = vadd.s32 120, %v1478_v33 }
 0x12a   : > { %v556_v15 = vadd.f32 %v555_v14, %v1440_v58  ;;  %v1526_v14 = vadd.s32 104, %v1478_v33 }
 0x12c   : > { %v557_v16 = vadd.f32 %v1430_v52, %v556_v15  ;;  %v1529_v15 = vadd.s32 144, %v1478_v33 }
 0x12e   : > { %v558_v17 = vadd.f32 %v1435_v55, %v557_v16  ;;  %v1532_v16 = vadd.s32 128, %v1478_v33 }
 0x130   : > { %v559_v18 = vadd.f32 %v558_v17, %v1453_v2  ;;  %v1535_v17 = vadd.s32 152, %v1478_v33 }
 0x132   : > { %v560_v19 = vadd.f32 %v559_v18, %v1458_v5  ;;  %v1538_v18 = vadd.s32 136, %v1478_v33 }
 0x134   : > { %v561_v21 = vadd.f32 %v1450_v0, %v560_v19  ;;  %v1541_v19 = vadd.s32 176, %v1478_v33 }
 0x136   : > { %v562_v27 = vadd.f32 %v1455_v3, %v561_v21  ;;  %v1552_v21 = vadd.s32 160, %v1478_v33 }
 0x138   : > { %v563_v29 = vrot.slane %v562_v27, 4 }
 0x13a   : > { %v564_v36 = vadd.f32 %v563_v29, %v562_v27  ;;  %v1558_v27 = vadd.s32 168, %v1478_v33  ;;  %v1561_v29 = vadd.s32 208, %v1478_v33 }
 0x13c   : > { %v565_v39 = vrot.slane %v564_v36, 2 }
 0x13e   : > { %v566_v63 = vadd.f32 %v565_v39, %v564_v36  ;;  %v1572_v36 = vadd.s32 192, %v1478_v33  ;;  %v1575_v39 = vadd.s32 216, %v1478_v33 }
 0x140   : > { %v567_v11 = vrot.slane %v566_v63, 1 }
 0x142   : > { %v568_v20 = vadd.f32 %v567_v11, %v566_v63  ;;  %v1578_v63 = vadd.s32 200, %v1478_v33 }
 0x144   : > { %v1580_v11 = vmul.f32 %v1162_v12, %v568_v20  ;;  %v1597_v12 = vadd.s32 248, %v1478_v33  ;;  %v1600_v20 = vadd.s32 232, %v1478_v33 }
 0x146   : > { %1931 = vst [vmem:[#allocation14_spill] sm:$0xff] %v1597_v12  ;;  %1932 = vst [vmem:[#allocation15_spill] sm:$0xff] %v1600_v20  ;;  %v639_v7 = vsub.f32 %v1382_v24, %v1580_v11  ;;  %v640_v4 = vsub.f32 %v1386_v26, %v1580_v11  ;;  %v641_v8 = vsub.f32 %v1380_v23, %v1580_v11 }
 0x147   : > { %v642_v9 = vsub.f32 %v1384_v25, %v1580_v11  ;;  %v643_v24 = vsub.f32 %v1402_v35, %v1580_v11  ;;  %v644_v23 = vsub.f32 %v1407_v38, %v1580_v11  ;;  %v645_v25 = vsub.f32 %v1397_v32, %v1580_v11 }
 0x148   : > { %v646_v26 = vsub.f32 %v1405_v37, %v1580_v11  ;;  %v647_v35 = vsub.f32 %v1422_v47, %v1580_v11  ;;  %v648_v32 = vsub.f32 %v1427_v50, %v1580_v11  ;;  %v649_v37 = vsub.f32 %v1417_v44, %v1580_v11 }
 0x149   : > { %v650_v38 = vsub.f32 %v1425_v49, %v1580_v11  ;;  %v651_v47 = vsub.f32 %v1442_v59, %v1580_v11  ;;  %v652_v44 = vsub.f32 %v1447_v62, %v1580_v11  ;;  %v653_v49 = vsub.f32 %v1437_v56, %v1580_v11 }
 0x14a   : > { %v654_v50 = vsub.f32 %v1445_v61, %v1580_v11  ;;  %vm638_vm1 = vcmp.lt.s32.totalorder %v1597_v12, %v1484_v45  ;;  %vm636_vm15 = vcmp.lt.s32.totalorder %v1600_v20, %v1484_v45  ;;  %v655_v59 = vsub.f32 %v1393_v30, %v1580_v11 }
 0x14b   : > { %v656_v56 = vsub.f32 %v1400_v34, %v1580_v11  ;;  %v657_v61 = vsub.f32 %v1390_v28, %v1580_v11  ;;  %v658_v62 = vsub.f32 %v1395_v31, %v1580_v11  ;;  %v659_v60 = vsub.f32 %v1413_v42, %v1580_v11 }
 0x14c   : > { %v660_v12 = vsub.f32 %v1420_v46, %v1580_v11  ;;  %v661_v20 = vsub.f32 %v1410_v40, %v1580_v11  ;;  %v662_v30 = vsub.f32 %v1415_v43, %v1580_v11  ;;  %v663_v34 = vsub.f32 %v1433_v54, %v1580_v11 }
 0x14d   : > { %v664_v28 = vsub.f32 %v1440_v58, %v1580_v11  ;;  %v665_v31 = vsub.f32 %v1430_v52, %v1580_v11  ;;  %v666_v42 = vsub.f32 %v1435_v55, %v1580_v11  ;;  %v667_v46 = vsub.f32 %v1453_v2, %v1580_v11 }
 0x14e   : > { %v668_v40 = vsub.f32 %v1458_v5, %v1580_v11  ;;  %v669_v43 = vsub.f32 %v1450_v0, %v1580_v11  ;;  %v670_v54 = vsub.f32 %v1455_v3, %v1580_v11  ;;  %v735_v58 = vsel %vm607_vm3, %v639_v7, 0.0 }
 0x14f   : > { %v736_v52 = vsel %vm608_vm5, %v640_v4, 0.0  ;;  %v737_v55 = vsel %vm609_vm2, %v641_v8, 0.0  ;;  %v738_v2 = vsel %vm610_vm4, %v642_v9, 0.0  ;;  %v739_v0 = vsel %vm611_vm7, %v643_v24, 0.0 }
 0x150   : > { %v740_v3 = vsel %vm612_vm9, %v644_v23, 0.0  ;;  %v741_v33 = vsel %vm613_vm6, %v645_v25, 0.0  ;;  %v742_v41 = vsel %vm614_vm8, %v646_v26, 0.0  ;;  %v743_v48 = vsel %vm615_vm11, %v647_v35, 0.0  ;;  %v1940_v23 = vld [vmem:[#allocation12_spill] sm:$0xff] }
 0x151   : > { %v744_v57 = vsel %vm616_vm13, %v648_v32, 0.0  ;;  %v745_v1 = vsel %vm617_vm10, %v649_v37, 0.0  ;;  %v746_v9 = vsel %vm618_vm12, %v650_v38, 0.0  ;;  %vm1938_vm2 = vcmp.lt.s32.totalorder %v1520_v10, %v1484_v45  ;;  %v838_v37 = vld [vmem:[#allocation2] sm:$0x1] }
 0x152   : > { %v747_v24 = vsel %vm1938_vm2, %v651_v47, 0.0  ;;  %vm1939_vm3 = vcmp.lt.s32.totalorder %v1526_v14, %v1484_v45  ;;  %vm1941_vm4 = vcmp.lt.s32.totalorder %v1940_v23, %v1484_v45  ;;  %vm1942_vm5 = vcmp.lt.s32.totalorder %v1523_v13, %v1484_v45 }
 0x153   : > { %v748_v6 = vsel %vm1939_vm3, %v652_v44, 0.0  ;;  %v749_v25 = vsel %vm1941_vm4, %v653_v49, 0.0  ;;  %v750_v26 = vsel %vm1942_vm5, %v654_v50, 0.0  ;;  %vm1943_vm6 = vcmp.lt.s32.totalorder %v1532_v16, %v1484_v45 }
 0x154   : > { %v751_v35 = vsel %vm1943_vm6, %v655_v59, 0.0  ;;  %vm1944_vm7 = vcmp.lt.s32.totalorder %v1538_v18, %v1484_v45  ;;  %vm1945_vm8 = vcmp.lt.s32.totalorder %v1529_v15, %v1484_v45  ;;  %vm1946_vm9 = vcmp.lt.s32.totalorder %v1535_v17, %v1484_v45 }
 0x155   : > { %v752_v10 = vsel %vm1944_vm7, %v656_v56, 0.0  ;;  %v753_v14 = vsel %vm1945_vm8, %v657_v61, 0.0  ;;  %v754_v13 = vsel %vm1946_vm9, %v658_v62, 0.0  ;;  %vm1947_vm10 = vcmp.lt.s32.totalorder %v1552_v21, %v1484_v45 }
 0x156   : > { %v1769_v16 = vsel %vm1947_vm10, %v659_v60, 0.0  ;;  %vm1948_vm11 = vcmp.lt.s32.totalorder %v1558_v27, %v1484_v45  ;;  %vm1949_vm12 = vcmp.lt.s32.totalorder %v1541_v19, %v1484_v45  ;;  %vm1950_vm13 = vcmp.lt.s32.totalorder %v1555_v22, %v1484_v45 }
 0x157   : > { %v1774_v18 = vsel %vm1948_vm11, %v660_v12, 0.0  ;;  %v1779_v15 = vsel %vm1949_vm12, %v661_v20, 0.0  ;;  %v1784_v17 = vsel %vm1950_vm13, %v662_v30, 0.0  ;;  %vm1951_vm2 = vcmp.lt.s32.totalorder %v1572_v36, %v1484_v45 }
 0x158   : > { %v1789_v60 = vsel %vm1951_vm2, %v663_v34, 0.0  ;;  %vm1952_vm3 = vcmp.lt.s32.totalorder %v1578_v63, %v1484_v45  ;;  %vm1953_vm4 = vcmp.lt.s32.totalorder %v1561_v29, %v1484_v45  ;;  %vm1954_vm5 = vcmp.lt.s32.totalorder %v1575_v39, %v1484_v45 }
 0x159   : > { %v1794_v21 = vsel %vm1952_vm3, %v664_v28, 0.0  ;;  %v1799_v19 = vsel %vm1953_vm4, %v665_v31, 0.0  ;;  %v1804_v22 = vsel %vm1954_vm5, %v666_v42, 0.0  ;;  %v1809_v27 = vsel %vm635_vm0, %v667_v46, 0.0 }
 0x15a   : > { %v1814_v63 = vsel %vm636_vm15, %v668_v40, 0.0  ;;  %v1819_v29 = vsel %vm637_vm14, %v669_v43, 0.0  ;;  %v1824_v39 = vsel %vm638_vm1, %v670_v54, 0.0  ;;  %v767_v53 = vmul.f32 %v735_v58, %v735_v58 }
 0x15b   : > { %v768_v32 = vmul.f32 %v736_v52, %v736_v52  ;;  %v844_v38 = vstv %s843_s28  ;;  %v769_v47 = vmul.f32 %v737_v55, %v737_v55  ;;  %v839_v49 = vsub.f32 %v1580_v11, %v838_v37 }
 0x15c   : > { %v856_v50 = vstv %s855_s29  ;;  %v770_v59 = vmul.f32 %v738_v2, %v738_v2  ;;  %v771_v62 = vmul.f32 %v739_v0, %v739_v0  ;;  %v772_v31 = vmul.f32 %v740_v3, %v740_v3 }
 0x15d   : > { %v799_v44 = vadd.f32 %v768_v32, %v767_v53  ;;  %v845_v61 = vmul.f32 %v844_v38, %v839_v49  ;;  %v850_v45 = vmul.f32 %v839_v49, %v839_v49  ;;  %v773_v46 = vmul.f32 %v741_v33, %v741_v33 }
 0x15e   : > { %v774_v43 = vmul.f32 %v742_v41, %v742_v41  ;;  %v775_v58 = vmul.f32 %v743_v48, %v743_v48  ;;  %v776_v11 = vmul.f32 %v744_v57, %v744_v57  ;;  %v777_v2 = vmul.f32 %v745_v1, %v745_v1 }
 0x15f   : > { %v800_v56 = vadd.f32 %v799_v44, %v769_v47  ;;  %v846_v34 = vadd.f32 %v845_v61, %v838_v37  ;;  %v1831_v28 = vmul.f32 %v856_v50, %v850_v45  ;;  %v778_v51 = vmul.f32 %v746_v9, %v746_v9 }
 0x160   : > { %v779_v0 = vmul.f32 %v747_v24, %v747_v24  ;;  %v780_v8 = vmul.f32 %v748_v6, %v748_v6  ;;  %v781_v36 = vmul.f32 %v749_v25, %v749_v25  ;;  %v782_v12 = vmul.f32 %v750_v26, %v750_v26 }
 0x161   : > { %v801_v30 = vadd.f32 %v800_v56, %v770_v59  ;;  %847 = vst [vmem:[#allocation2] sm:$0x1] %v846_v34  ;;  %v783_v33 = vmul.f32 %v751_v35, %v751_v35  ;;  %v784_v41 = vmul.f32 %v752_v10, %v752_v10  ;;  %v785_v48 = vmul.f32 %v753_v14, %v753_v14 }
 0x162   : > { %v786_v57 = vmul.f32 %v754_v13, %v754_v13  ;;  %v787_v1 = vmul.f32 %v1769_v16, %v1769_v16  ;;  %v788_v24 = vmul.f32 %v1774_v18, %v1774_v18  ;;  %v789_v25 = vmul.f32 %v1779_v15, %v1779_v15 }
 0x163   : > { %v802_v42 = vadd.f32 %v801_v30, %v771_v62  ;;  %v790_v35 = vmul.f32 %v1784_v17, %v1784_v17  ;;  %v791_v14 = vmul.f32 %v1789_v60, %v1789_v60  ;;  %v792_v16 = vmul.f32 %v1794_v21, %v1794_v21 }
 0x164   : > { %v793_v18 = vmul.f32 %v1799_v19, %v1799_v19  ;;  %v794_v15 = vmul.f32 %v1804_v22, %v1804_v22  ;;  %v795_v17 = vmul.f32 %v1809_v27, %v1809_v27  ;;  %v796_v60 = vmul.f32 %v1814_v63, %v1814_v63 }
 0x165   : > { %v803_v40 = vadd.f32 %v802_v42, %v772_v31  ;;  %v797_v21 = vmul.f32 %v1819_v29, %v1819_v29  ;;  %v798_v19 = vmul.f32 %v1824_v39, %v1824_v39  ;;  %v848_v31 = vld [vmem:[#allocation3] sm:$0x1]  ;;  %vm871_vm14 = vcmask 1040384  }
 0x167   : > { %v804_v54 = vadd.f32 %v803_v40, %v773_v46 }
 0x168   : > { %v863_v29 = vld [vmem:[#allocation2] sm:$0x1] }
 0x169   : > { %v805_v52 = vadd.f32 %v804_v54, %v774_v43 }
 0x16b   : > { %v806_v55 = vadd.f32 %v805_v52, %v775_v58 }
 0x16d   : > { %v807_v5 = vadd.f32 %v806_v55, %v776_v11 }
 0x16f   : > { %v808_v4 = vadd.f32 %v807_v5, %v777_v2 }
 0x171   : > { %v809_v7 = vadd.f32 %v808_v4, %v778_v51 }
 0x173   : > { %v810_v23 = vadd.f32 %v809_v7, %v779_v0 }
 0x175   : > { %v811_v3 = vadd.f32 %v810_v23, %v780_v8 }
 0x177   : > { %v812_v20 = vadd.f32 %v811_v3, %v781_v36 }
 0x179   : > { %v813_v53 = vadd.f32 %v812_v20, %v782_v12 }
 0x17b   : > { %v814_v32 = vadd.f32 %v813_v53, %v783_v33 }
 0x17d   : > { %v815_v37 = vadd.f32 %v814_v32, %v784_v41 }
 0x17f   : > { %v816_v38 = vadd.f32 %v815_v37, %v785_v48 }
 0x181   : > { %v817_v9 = vadd.f32 %v816_v38, %v786_v57 }
 0x183   : > { %v818_v6 = vadd.f32 %v817_v9, %v787_v1 }
 0x185   : > { %v819_v26 = vadd.f32 %v818_v6, %v788_v24 }
 0x187   : > { %v820_v10 = vadd.f32 %v819_v26, %v789_v25 }
 0x189   : > { %v821_v13 = vadd.f32 %v820_v10, %v790_v35 }
 0x18b   : > { %v822_v47 = vadd.f32 %v821_v13, %v791_v14 }
 0x18d   : > { %v823_v44 = vadd.f32 %v822_v47, %v792_v16 }
 0x18f   : > { %v824_v49 = vadd.f32 %v823_v44, %v793_v18 }
 0x191   : > { %v825_v50 = vadd.f32 %v824_v49, %v794_v15 }
 0x193   : > { %v826_v59 = vadd.f32 %v825_v50, %v795_v17 }
 0x195   : > { %v827_v56 = vadd.f32 %v826_v59, %v796_v60 }
 0x197   : > { %v828_v61 = vadd.f32 %v827_v56, %v797_v21 }
 0x199   : > { %v829_v45 = vadd.f32 %v828_v61, %v798_v19 }
 0x19b   : > { %v830_v22 = vrot.slane %v829_v45, 4 }
 0x19d   : > { %v831_v62 = vadd.f32 %v830_v22, %v829_v45 }
 0x19f   : > { %v832_v30 = vrot.slane %v831_v62, 2 }
 0x1a1   : > { %v833_v27 = vadd.f32 %v832_v30, %v831_v62 }
 0x1a3   : > { %v834_v34 = vrot.slane %v833_v27, 1 }
 0x1a5   : > { %v835_v42 = vadd.f32 %v834_v34, %v833_v27 }
 0x1a7   : > { %v849_v63 = vadd.f32 %v848_v31, %v835_v42 }
 0x1a9   : > { %v858_v46 = vadd.f32 %v1831_v28, %v849_v63 }
 0x1ab   : > { %859 = vst [vmem:[#allocation3] sm:$0x1] %v858_v46 }
 0x1b2   : > { %v1006_v39 = vld [vmem:[#allocation3] ss:$0 sm:$0xff] }
 0x1b3   : > { %v872_v40 = vsel %vm871_vm14, %v863_v29, %v1006_v39 }
 0x1b4   : > { %873 = vst [vmem:[%s154_s4] sm:$0x3] %v872_v40 }
 0x1b5   : > { %1176 = shalt.err (!%p1173_p7)
}
 0x1b6   : > { %s1177_s27 = scalar_lea.hbm %s1863_s8, 32  ;;  %s1181_s25 = scalar_lea.hbm %s1912_s2, 64 }
 0x1b7   : > { %p1178_p9 = scmp.ne.s32.totalorder %s1863_s8, %s1177_s27  ;;  %p1182_p12 = scmp.lt.u32.totalorder %s1863_s8, %s1912_s2 }
 0x1b8   : > { %p1183_p13 = scmp.lt.u32.totalorder %s1181_s25, %s1177_s27  ;;  %p1185_p1 = scmp.lt.u32.totalorder %s1177_s27, %s1863_s8 }
 0x1b9   : > { %p1179_p10 = pnand %p1178_p9, %p1301_p4 }
 0x1ba   : > { %p1184_p0 = por %p1183_p13, %p1182_p12 }
 0x1bb   : > { %p1180_p11 = pneg %p1179_p10 }
 0x1bc   : > { %p1186_p2 = por %p1185_p1, %p1184_p0 }
 0x1be   : > { %p1187_p3 = pnand %p1186_p2, %p1180_p11 }
 0x1c0   : > { %1190 = shalt.err (!%p1187_p3)
}
 0x1c1   : > { %1083 = dma.vmem_to_hbm [thread:$0]  (%p1301_p4), %s1865_s5, 32, %s1863_s8, %s875_s15  }
 0x1c2 PF: > { %p1089_p5 = scmp.ge.s32.totalorder %s1241_s14, 2  ;;  %s900_s29 = sand.u32 1, %s1221_s9  }
 0x1c3   : > { %s901_s30 = scalar_lea.sflag [#allocation5], %s900_s29 }
 0x1c4   : > { %p1086_p6 = pnand %p1089_p5, %p1308_p8 }
 0x1c6   : > { %1216 = dma.done.wait (!%p1086_p6), %s901_s30, 32  }
 0x1c7   : > { %1218 = vsyncadd (!%p1086_p6), %s901_s30, 4294967264  ;;  %s15_s14 = sadd.s32 1, %s1241_s14   ;;  %s1958_s9 = smov %s1225_s10 }
 0x1c8   : > { %p12_p7 = scmp.ge.s32.totalorder %s15_s14, 4   ;;  %s1959_s10 = smov %s1229_s11 }
 0x1c9   : > { %s1960_s11 = smov %s1314_s22  ;;  %s1961_s12 = smov %s1237_s13 }
 0x1ca   : > { %s1962_s13 = smov %s1964_s17  ;;  %14 = sbr.rel (!%p12_p7) target bundleno = 4 (0x4), region = 71 }
 0x1d1   :  { %906 = vsyncpa [#allocation5], 1 }
 0x1d2   :  { %908 = vsyncpa [#allocation5 + $0x1], 1 }

</bundles_post_ra>
